<compile_context>
chip_gen: v5e
topology: v5e:2x2
jax: 0.10.0
libtpu: 0.0.40
codegen_flags: <defaults>
</compile_context>

<pallas_src>
import functools

import jax
import jax.numpy as jnp
import numpy as np
from jax.experimental import pallas as pl
from jax.experimental.pallas import tpu as pltpu


def _round_up(a, b):
    return (a + b - 1) // b * b


def _pick_tile(dim, tmax, step):
    """Largest tile (multiple of `step`, <= tmax) minimizing the padded size of `dim`."""
    dim = _round_up(max(int(dim), 1), step)
    tmax_floor = (int(tmax) // step) * step
    tmax_eff = max(step, min(tmax_floor, dim))
    best_t, best_padded = step, _round_up(dim, step)
    for t in range(step, tmax_eff + 1, step):
        padded = _round_up(dim, t)
        if padded < best_padded or (padded == best_padded and t > best_t):
            best_t, best_padded = t, padded
    return best_t


def _mxu_has_int8():
    # v7x MXU has no integer path -> feed bf16 there; v5e/v6e have native int8.
    name = ""
    try:
        info = pltpu.get_tpu_info()
        name = str(getattr(info, "chip_version", "") or "")
    except Exception:
        name = ""
    if not name:
        try:
            name = jax.devices()[0].device_kind
        except Exception:
            name = ""
    name = name.lower()
    return not ("v7" in name)


def _vmem_capacity_bytes():
    try:
        cap = int(getattr(pltpu.get_tpu_info(), "vmem_capacity_bytes", 0))
        if cap > 0:
            return cap
    except Exception:
        pass
    return 64 << 20  # conservative: v7x per-TC physical VMEM


def _qlinear_kernel(x_ref, w_ref, b_ref, s_ref, o_ref, acc_ref, *,
                    output_zero_point, qmin, qmax, int8_mxu, f32_acc):
    k = pl.program_id(2)

    if int8_mxu:
        # int8 x int8 -> int32 on the MXU (v5e/v6e fast path), exact accumulation.
        part = jax.lax.dot_general(
            x_ref[...], w_ref[...],
            dimension_numbers=(((1,), (0,)), ((), ())),
            preferred_element_type=jnp.int32)
    else:
        # v7x: bf16 feed (exact for |v| <= 128), f32 accumulate. Per-K-tile
        # partial sum <= tk * 127^2 < 2^24 for tk <= 1024, so it is an exact
        # integer in f32.
        part = jax.lax.dot_general(
            x_ref[...].astype(jnp.bfloat16), w_ref[...].astype(jnp.bfloat16),
            dimension_numbers=(((1,), (0,)), ((), ())),
            preferred_element_type=jnp.float32)
        if not f32_acc:
            part = part.astype(jnp.int32)

    @pl.when(k == 0)
    def _():
        acc_ref[...] = part          # write-through: no zero-init pass

    @pl.when(k > 0)
    def _():
        acc_ref[...] += part

    @pl.when(k == pl.num_programs(2) - 1)
    def _():
        acc = acc_ref[...]
        if f32_acc:
            acc = acc.astype(jnp.int32)   # exact: total |acc| < 2^24 by construction
        acc = acc + b_ref[...]            # int32 domain, matches reference bit-exactly
        out = acc.astype(jnp.float32) * s_ref[...]          # per-channel requant
        out = out + jnp.float32(output_zero_point)
        out = jnp.round(out)                                 # round-half-to-even
        out = jnp.clip(out, jnp.float32(qmin), jnp.float32(qmax))
        o_ref[...] = out.astype(o_ref.dtype)


def _qlinear_call(x_p, w_t_p, b_p, s_p, *, tb, tn, tk, output_zero_point,
                  qmin, qmax, int8_mxu, f32_acc):
    N_p, IC_p = x_p.shape
    IC_p2, OC_p = w_t_p.shape
    assert IC_p == IC_p2
    grid = (N_p // tb, OC_p // tn, IC_p // tk)
    acc_dtype = jnp.float32 if f32_acc else jnp.int32

    # Rough VMEM footprint: double-buffered int8 x/w/out tiles + resident acc.
    footprint = (2 * tb * tk + 2 * tk * tn     # int8 x / w tiles (2-deep)
                 + 2 * tb * tn                  # int8 out tiles (2-deep)
                 + tb * tn * 4                  # accumulator
                 + 4 * tn * 4)                  # bias + scale rows (2-deep)
    vmem_limit = int(min(_vmem_capacity_bytes(),
                         max(32 << 20, footprint + (16 << 20))))

    kernel = functools.partial(
        _qlinear_kernel,
        output_zero_point=int(output_zero_point), qmin=qmin, qmax=qmax,
        int8_mxu=int8_mxu, f32_acc=f32_acc)

    return pl.pallas_call(
        kernel,
        out_shape=jax.ShapeDtypeStruct((N_p, OC_p), jnp.int8),
        grid_spec=pltpu.PrefetchScalarGridSpec(
            num_scalar_prefetch=0,
            grid=grid,
            in_specs=[
                pl.BlockSpec((tb, tk), lambda i, j, k: (i, k)),   # x        [N_p, IC_p]
                pl.BlockSpec((tk, tn), lambda i, j, k: (k, j)),   # weight^T [IC_p, OC_p]
                pl.BlockSpec((1, tn), lambda i, j, k: (0, j)),    # bias int32
                pl.BlockSpec((1, tn), lambda i, j, k: (0, j)),    # requant scale f32
            ],
            out_specs=pl.BlockSpec((tb, tn), lambda i, j, k: (i, j)),
            scratch_shapes=[pltpu.VMEM((tb, tn), acc_dtype)],
        ),
        compiler_params=pltpu.CompilerParams(
            dimension_semantics=("parallel", "parallel", "arbitrary"),
            vmem_limit_bytes=vmem_limit),
    )(x_p, w_t_p, b_p, s_p)


class QuantizedLinearPallas:
    """Mirrors the PyTorch QuantizedLinear module. Weight transpose/padding and
    requant-scale computation are done ONCE at construction (hoisted out of the
    per-call hot path)."""

    def __init__(self, weight, bias, input_zero_point, output_zero_point,
                 input_scale, weight_scale, output_scale,
                 feature_bitwidth=8, weight_bitwidth=8,
                 *, tb=512, tn=1024, tk=2048, int8_mxu=None):
        # input_zero_point is pre-folded into the int32 bias by the TinyML
        # conversion; weight_bitwidth only affected upstream quantization.
        # Neither appears in the PyTorch reference forward.
        del input_zero_point, weight_bitwidth

        OC, IC = weight.shape
        self.OC, self.IC = OC, IC
        self.N_tile_max = int(tb)
        self.int8_mxu = _mxu_has_int8() if int8_mxu is None else bool(int8_mxu)
        self.qmin = -(1 << (feature_bitwidth - 1))
        self.qmax = (1 << (feature_bitwidth - 1)) - 1
        self.output_zero_point = int(output_zero_point)

        # Tile selection: lane axis multiples of 128, minimal padding waste.
        tk_cap = tk if self.int8_mxu else min(tk, 1024)   # bf16 path exactness bound
        self.tn = _pick_tile(OC, tn, 128)
        self.tk = _pick_tile(IC, tk_cap, 128)
        assert self.int8_mxu or self.tk <= 1024
        self.OC_p = _round_up(OC, self.tn)
        self.IC_p = _round_up(IC, self.tk)
        # v7x: accumulate directly in f32 when the whole reduction stays exact.
        self.f32_acc = (not self.int8_mxu) and (self.IC_p <= 1024)

        # One-time weight prep: transpose to [IC, OC] (no per-K RHS relayout) + pad.
        w_t = jnp.asarray(weight, jnp.int8).T
        if (self.IC_p, self.OC_p) != (IC, OC):
            w_t = jnp.zeros((self.IC_p, self.OC_p), jnp.int8).at[:IC, :OC].set(w_t)
        self.w_t_p = w_t

        b = jnp.reshape(jnp.asarray(bias, jnp.int32), (-1,))
        self.b_p = jnp.zeros((1, self.OC_p), jnp.int32).at[0, :OC].set(b)

        scale = (jnp.float32(input_scale)
                 * jnp.reshape(jnp.asarray(weight_scale, jnp.float32), (-1,))
                 / jnp.float32(output_scale))
        self.s_p = jnp.zeros((1, self.OC_p), jnp.float32).at[0, :OC].set(scale)

    def __call__(self, x):
        N, IC = x.shape
        assert IC == self.IC
        tb = _pick_tile(N, self.N_tile_max, 32)
        tn = self.tn
        N_p = _round_up(N, tb)
        OC_p = self.OC_p
        # v7x has 2 TensorCores: split the OC tile when there would otherwise be
        # a single parallel output block (only when alignment allows it).
        if (N_p // tb) * (OC_p // tn) < 2 and tn % 256 == 0:
            tn //= 2

        x_p = jnp.asarray(x, jnp.int8)
        if (N_p, self.IC_p) != (N, IC):
            x_p = jnp.zeros((N_p, self.IC_p), jnp.int8).at[:N, :IC].set(x_p)

        out_p = _qlinear_call(
            x_p, self.w_t_p, self.b_p, self.s_p,
            tb=tb, tn=tn, tk=self.tk,
            output_zero_point=self.output_zero_point,
            qmin=self.qmin, qmax=self.qmax,
            int8_mxu=self.int8_mxu, f32_acc=self.f32_acc)

        if (N_p, OC_p) != (N, self.OC):
            out_p = out_p[:N, :self.OC]
        return out_p


def quantized_linear(x, weight, bias, feature_bitwidth, weight_bitwidth,
                     input_zero_point, output_zero_point,
                     input_scale, weight_scale, output_scale,
                     *, tb=512, tn=1024, tk=2048, int8_mxu=None):
    """One-shot functional form matching the PyTorch reference signature.
    For repeated calls, build QuantizedLinearPallas once so weight prep stays
    out of the hot path."""
    mod = QuantizedLinearPallas(
        weight, bias, input_zero_point, output_zero_point,
        input_scale, weight_scale, output_scale,
        feature_bitwidth, weight_bitwidth,
        tb=tb, tn=tn, tk=tk, int8_mxu=int8_mxu)
    return mod(x)


def _reference(x, weight, bias, feature_bitwidth, output_zero_point,
               input_scale, weight_scale, output_scale):
    qmin = -(1 << (feature_bitwidth - 1))
    qmax = (1 << (feature_bitwidth - 1)) - 1
    acc = (np.asarray(x, np.int32) @ np.asarray(weight, np.int32).T
           + np.asarray(bias, np.int32).reshape(-1))
    scale = (np.float32(input_scale)
             * np.asarray(weight_scale, np.float32).reshape(-1)
             / np.float32(output_scale))
    out = acc.astype(np.float32) * scale
    out = out + np.float32(output_zero_point)
    out = np.clip(np.rint(out), qmin, qmax)
    return out.astype(np.int8)


if __name__ == "__main__":
    # Small deterministic problem; odd sizes exercise padding / tile picking.
    N, IC, OC = 80, 384, 272
    feature_bitwidth = 8
    weight_bitwidth = 8

    key = jax.random.PRNGKey(0)
    kx, kw, kb, ks = jax.random.split(key, 4)

    x = jax.random.randint(kx, (N, IC), -128, 128, dtype=jnp.int32).astype(jnp.int8)
    weight = jax.random.randint(kw, (OC, IC), -128, 128, dtype=jnp.int32).astype(jnp.int8)
    bias = jax.random.randint(kb, (OC,), -512, 512, dtype=jnp.int32)  # zero-point pre-folded
    weight_scale = jax.random.uniform(ks, (OC, 1), jnp.float32, 0.01, 0.05)

    input_zero_point = 0
    output_zero_point = 3
    input_scale = 0.02
    output_scale = 0.5

    ref = _reference(np.asarray(x), np.asarray(weight), np.asarray(bias),
                     feature_bitwidth, output_zero_point,
                     input_scale, np.asarray(weight_scale), output_scale)

    # (1) Small explicit tiles: exercises padding and a multi-step K reduction
    #     with the resident accumulator (init / accumulate / epilogue).
    out_small = quantized_linear(
        x, weight, bias, feature_bitwidth, weight_bitwidth,
        input_zero_point, output_zero_point,
        input_scale, weight_scale, output_scale,
        tb=32, tn=128, tk=128)
    out_small = jax.block_until_ready(out_small)
    np.testing.assert_array_equal(np.asarray(out_small), ref)

    # (2) Default (large) tiles via the prepared-module hot path.
    mod = QuantizedLinearPallas(
        weight, bias, input_zero_point, output_zero_point,
        input_scale, weight_scale, output_scale,
        feature_bitwidth, weight_bitwidth)
    out_big = jax.block_until_ready(mod(x))
    np.testing.assert_array_equal(np.asarray(out_big), ref)

    print("KERNEL_OK")
</pallas_src>

<mosaic_0001>
module attributes {stable_mosaic.version = 11 : i64} {
  func.func @_qlinear_kernel(%arg0: i32, %arg1: i32, %arg2: i32, %arg3: memref<32x128xi8, #tpu.memory_space<vmem>>, %arg4: memref<128x128xi8, #tpu.memory_space<vmem>>, %arg5: memref<1x128xi32, #tpu.memory_space<vmem>>, %arg6: memref<1x128xf32, #tpu.memory_space<vmem>>, %arg7: memref<32x128xi8, #tpu.memory_space<vmem>>, %arg8: memref<32x128xi32, #tpu.memory_space<vmem>>) attributes {dimension_semantics = [#tpu.dimension_semantics<parallel>, #tpu.dimension_semantics<parallel>, #tpu.dimension_semantics<arbitrary>], iteration_bounds = array<i64: 3, 3, 3>, scalar_prefetch = 0 : i64, scratch_operands = 1 : i64, tpu.core_type = #tpu.core_type<tc>, window_params = [{transform_indices = @transform_0, window_bounds = array<i64: 32, 128>}, {transform_indices = @transform_1, window_bounds = array<i64: 128, 128>}, {transform_indices = @transform_2, window_bounds = array<i64: 1, 128>}, {transform_indices = @transform_3, window_bounds = array<i64: 1, 128>}, {transform_indices = @transform_4, window_bounds = array<i64: 32, 128>}]} {
    %c0 = arith.constant 0 : index
    %c0_0 = arith.constant 0 : index
    %0 = vector.load %arg3[%c0, %c0_0] : memref<32x128xi8, #tpu.memory_space<vmem>>, vector<32x128xi8>
    %c0_1 = arith.constant 0 : index
    %c0_2 = arith.constant 0 : index
    %1 = vector.load %arg4[%c0_1, %c0_2] : memref<128x128xi8, #tpu.memory_space<vmem>>, vector<128x128xi8>
    %cst = arith.constant dense<0> : vector<32x128xi32>
    %2 = tpu.matmul %0, %1, %cst {dimension_numbers = #tpu.dot_dimension_numbers<[1], [0], [0], [1], [0, 0, 1, 1], [], []>} : vector<32x128xi8>, vector<128x128xi8>, vector<32x128xi32> -> vector<32x128xi32>
    %c0_i32 = arith.constant 0 : i32
    %3 = arith.cmpi eq, %arg2, %c0_i32 : i32
    %4 = arith.extui %3 : i1 to i32
    %c0_i32_3 = arith.constant 0 : i32
    %5 = arith.cmpi ne, %4, %c0_i32_3 : i32
    scf.if %5 {
      %c0_7 = arith.constant 0 : index
      %c0_8 = arith.constant 0 : index
      %12 = vector.load %arg8[%c0_7, %c0_8] : memref<32x128xi32, #tpu.memory_space<vmem>>, vector<32x128xi32>
      tpu.vector_store %arg8[%c0_7, %c0_8], %2 {strides = array<i32>} : memref<32x128xi32, #tpu.memory_space<vmem>>, vector<32x128xi32>,
    } else {
    }
    %c0_i32_4 = arith.constant 0 : i32
    %6 = arith.cmpi sgt, %arg2, %c0_i32_4 : i32
    %7 = arith.extui %6 : i1 to i32
    %c0_i32_5 = arith.constant 0 : i32
    %8 = arith.cmpi ne, %7, %c0_i32_5 : i32
    scf.if %8 {
      %c0_7 = arith.constant 0 : index
      %c0_8 = arith.constant 0 : index
      %12 = vector.load %arg8[%c0_7, %c0_8] : memref<32x128xi32, #tpu.memory_space<vmem>>, vector<32x128xi32>
      %13 = arith.addi %12, %2 : vector<32x128xi32>
      %c0_9 = arith.constant 0 : index
      %c0_10 = arith.constant 0 : index
      %14 = vector.load %arg8[%c0_9, %c0_10] : memref<32x128xi32, #tpu.memory_space<vmem>>, vector<32x128xi32>
      tpu.vector_store %arg8[%c0_9, %c0_10], %13 {strides = array<i32>} : memref<32x128xi32, #tpu.memory_space<vmem>>, vector<32x128xi32>,
    } else {
    }
    %c2_i32 = arith.constant 2 : i32
    %9 = arith.cmpi eq, %arg2, %c2_i32 : i32
    %10 = arith.extui %9 : i1 to i32
    %c0_i32_6 = arith.constant 0 : i32
    %11 = arith.cmpi ne, %10, %c0_i32_6 : i32
    scf.if %11 {
      %c0_7 = arith.constant 0 : index
      %c0_8 = arith.constant 0 : index
      %12 = vector.load %arg8[%c0_7, %c0_8] : memref<32x128xi32, #tpu.memory_space<vmem>>, vector<32x128xi32>
      %c0_9 = arith.constant 0 : index
      %c0_10 = arith.constant 0 : index
      %13 = vector.load %arg5[%c0_9, %c0_10] : memref<1x128xi32, #tpu.memory_space<vmem>>, vector<1x128xi32>
      %14 = vector.broadcast %13 : vector<1x128xi32> to vector<32x128xi32>
      %15 = arith.addi %12, %14 : vector<32x128xi32>
      %16 = arith.sitofp %15 : vector<32x128xi32> to vector<32x128xf32>
      %c0_11 = arith.constant 0 : index
      %c0_12 = arith.constant 0 : index
      %17 = vector.load %arg6[%c0_11, %c0_12] : memref<1x128xf32, #tpu.memory_space<vmem>>, vector<1x128xf32>
      %18 = vector.broadcast %17 : vector<1x128xf32> to vector<32x128xf32>
      %19 = arith.mulf %16, %18 : vector<32x128xf32>
      %cst_13 = arith.constant 3.000000e+00 : f32
      %20 = vector.broadcast %cst_13 : f32 to vector<32x128xf32>
      %21 = arith.addf %19, %20 : vector<32x128xf32>
      %22 = math.roundeven %21 : vector<32x128xf32>
      %cst_14 = arith.constant -1.280000e+02 : f32
      %cst_15 = arith.constant 1.270000e+02 : f32
      %23 = vector.broadcast %cst_14 : f32 to vector<32x128xf32>
      %24 = arith.maximumf %23, %22 : vector<32x128xf32>
      %25 = vector.broadcast %cst_15 : f32 to vector<32x128xf32>
      %26 = arith.minimumf %25, %24 : vector<32x128xf32>
      %27 = arith.fptosi %26 : vector<32x128xf32> to vector<32x128xi8>
      %c0_16 = arith.constant 0 : index
      %c0_17 = arith.constant 0 : index
      %28 = vector.load %arg7[%c0_16, %c0_17] : memref<32x128xi8, #tpu.memory_space<vmem>>, vector<32x128xi8>
      tpu.vector_store %arg7[%c0_16, %c0_17], %27 {strides = array<i32>} : memref<32x128xi8, #tpu.memory_space<vmem>>, vector<32x128xi8>,
    } else {
    }
    return
  }
  func.func @transform_0(%arg0: i32, %arg1: i32, %arg2: i32) -> (i32, i32) {
    %c0_i32 = arith.constant 0 : i32
    return %arg0, %arg2 : i32, i32
  }
  func.func @transform_1(%arg0: i32, %arg1: i32, %arg2: i32) -> (i32, i32) {
    %c0_i32 = arith.constant 0 : i32
    return %arg2, %arg1 : i32, i32
  }
  func.func @transform_2(%arg0: i32, %arg1: i32, %arg2: i32) -> (i32, i32) {
    %c0_i32 = arith.constant 0 : i32
    %c0_i32_0 = arith.constant 0 : i32
    return %c0_i32, %arg1 : i32, i32
  }
  func.func @transform_3(%arg0: i32, %arg1: i32, %arg2: i32) -> (i32, i32) {
    %c0_i32 = arith.constant 0 : i32
    %c0_i32_0 = arith.constant 0 : i32
    return %c0_i32, %arg1 : i32, i32
  }
  func.func @transform_4(%arg0: i32, %arg1: i32, %arg2: i32) -> (i32, i32) {
    %c0_i32 = arith.constant 0 : i32
    return %arg0, %arg1 : i32, i32
  }
}

</mosaic_0001>

<bundles_post_ra>
// kernel: tpu_custom_call.1
= control target key start
LH: loop header
LB: loop body
LE: loop exit
PB: predicated region body
PF: predicated region fallthrough
CT: control target
= control target key end

     0   :  { %s1593_s0 = inlined_call_operand.hbm [shape: s8[96,384], index: 0, kind: input, shape index: {}]   ;;  %s1594_s1 = inlined_call_operand.hbm [shape: s8[384,384], index: 1, kind: input, shape index: {}]   ;;  %s1595_s2 = inlined_call_operand.hbm [shape: s32[1,384], index: 2, kind: input, shape index: {}]   ;;  %s1596_s3 = inlined_call_operand.hbm [shape: f32[1,384], index: 3, kind: input, shape index: {}]   ;;  %s1597_s4 = inlined_call_operand.hbm [shape: s8[96,384], index: 4, kind: output, shape index: {}]  }
   0x1   :  { %1614 = sst [smem:[#allocation34_spill]] %s1593_s0 }
   0x2   :  { %1615 = sst [smem:[#allocation35_spill]] %s1594_s1 }
   0x3   :  { %1616 = sst [smem:[#allocation36_spill]] %s1595_s2 }
   0x4   :  { %1617 = sst [smem:[#allocation37_spill]] %s1596_s3 }
   0x5   :  { %1618 = sst [smem:[#allocation38_spill]] %s1597_s4 }
   0x6   :  { %9 = vsyncpa [#allocation4], 0 }
   0x7   :  { %11 = vsyncpa [#allocation4 + $0x1], 0 }
   0x8   :  { %12 = vsyncpa [#allocation7], 0 }
   0x9   :  { %14 = vsyncpa [#allocation7 + $0x1], 0 }
   0xa   :  { %15 = vsyncpa [#allocation10], 0 }
   0xb   :  { %17 = vsyncpa [#allocation10 + $0x1], 0 }
   0xc   :  { %18 = vsyncpa [#allocation5], 0 }
   0xd   :  { %20 = vsyncpa [#allocation5 + $0x1], 0  ;;  %s1214_s15 = smov 0   ;;  %s1216_s16 = smov 0  }
   0xe   :  { %s1218_s17 = smov 0   ;;  %s1220_s18 = smov 0  }
   0xf   :  { %s1222_s19 = smov 0   ;;  %s1224_s20 = smov 0  }
  0x10   :  { %s1226_s21 = smov 0   ;;  %s1228_s22 = smov 0  }
  0x11   :  { %s1230_s23 = smov 0   ;;  %s1232_s24 = smov 0  }
  0x12   :  { %s1234_s25 = smov 0   ;;  %s1236_s26 = smov 0  }
  0x13   :  { %s1238_s27 = smov 0   ;;  %s1240_s28 = smov 0  }
  0x14   :  { %s1242_s29 = smov 0   ;;  %s1244_s30 = smov 0  }
  0x15   :  { %s1246_s5 = smov 0   ;;  %s1248_s6 = smov 0  }
  0x16   :  { %s1250_s7 = smov 0  }
  0x17 LB: > { %1619 = sst [smem:[#allocation17_spill]] %s1144_s23  ;;  %p1608_p0 = scmp.eq.s32.totalorder %s1184_s7, 0  ;;  %s1184_s7 = sphi %s1250_s7, %s26_s7   ;;  %s1180_s6 = sphi %s1248_s6, %s1689_s6   ;;  %s1176_s5 = sphi %s1246_s5, %s1688_s5   ;;  %s1172_s30 = sphi %s1244_s30, %s1671_s30   ;;  %s1168_s29 = sphi %s1242_s29, %s1687_s29   ;;  %s1164_s28 = sphi %s1240_s28, %s1686_s28   ;;  %s1160_s27 = sphi %s1238_s27, %s1685_s27   ;;  %s1156_s26 = sphi %s1236_s26, %s1684_s26   ;;  %s1152_s25 = sphi %s1234_s25, %s1667_s25   ;;  %s1148_s24 = sphi %s1232_s24, %s1683_s24   ;;  %s1144_s23 = sphi %s1230_s23, %s1665_s23   ;;  %s1140_s22 = sphi %s1228_s22, %s1682_s22   ;;  %s1136_s21 = sphi %s1226_s21, %s1681_s21   ;;  %s1132_s20 = sphi %s1224_s20, %s1680_s20   ;;  %s1128_s19 = sphi %s1222_s19, %s1679_s19   ;;  %s1124_s18 = sphi %s1220_s18, %s1677_s18   ;;  %s1120_s17 = sphi %s1218_s17, %s1676_s17   ;;  %s1116_s16 = sphi %s1216_s16, %s1674_s16   ;;  %s1112_s15 = sphi %s1214_s15, %s1672_s15  }
  0x18   : > { %1620 = sst [smem:[#allocation18_spill]] %s1152_s25  ;;  %p89_p1 = scmp.ne.s32.totalorder %s1144_s23, %s1140_s22 }
  0x19   : > { %1621 = sst [smem:[#allocation19_spill]] %s1156_s26  ;;  %p95_p2 = scmp.ne.s32.totalorder %s1140_s22, %s1136_s21 }
  0x1a   : > { %1622 = sst [smem:[#allocation20_spill]] %s1160_s27  ;;  %p707_p3 = scmp.lt.s32.totalorder %s1184_s7, 27 }
  0x1b   : > { %1623 = sst [smem:[#allocation21_spill]] %s1164_s28  ;;  %p91_p4 = por %p89_p1, %p1608_p0 }
  0x1c   : > { %1624 = sst [smem:[#allocation22_spill]] %s1168_s29  ;;  %s220_s9 = sand.u32 1, %s1184_s7  }
  0x1d   : > { %1625 = sst [smem:[#allocation23_spill]] %s1172_s30  ;;  %s222_s10 = sand.u32 1, %s1144_s23  }
  0x1e   : > { %1626 = sst [smem:[#allocation24_spill]] %s1180_s6  ;;  %s630_s11 = sshll.u32 %s222_s10, 5 }
  0x1f   : > { %s666_s12 = smul.u32 12, %s1172_s30  ;;  %p1323_p5 = pnand %p707_p3, %p91_p4 }
  0x20   : > { %s224_s8 = scalar_lea.vmem [#allocation6], %s630_s11  ;;  %s1628_s1 = sld [smem:[#allocation35_spill]] }
  0x21   : > { %s229_s14 = sadd.s32 %s1176_s5, %s666_s12  ;;  %s234_s4 = sshll.u32 %s224_s8, 4  ;;  %s235_s4 = int_to_ptr.vmem [resolvable:$true] %s234_s4 }
  0x22   : > { %s633_s28 = sshll.u32 %s229_s14, 3  ;;  %p634_p6 = scmp.ge.s32.totalorder %s1184_s7, 1 }
  0x23   : > { %s1332_s12 = scalar_lea.sflag [#allocation7], %s220_s9  ;;  %s1186_s8 = smov 384  }
  0x24   : > { %s1187_s11 = smov 128   ;;  %s1188_s14 = smov 8  }
  0x25   : > { %p276_p7 = scmp.lt.s32.totalorder %s1184_s7, 28  ;;  %s38_s9 = sadd.s32 1, %s1172_s30 }
  0x26   : > { %s231_s10 = scalar_lea.hbm %s1628_s1, %s633_s28  ;;  %s1343_s28 = sadd.s32 4294967295, %s1184_s7  }
  0x27   : > { %s232_s3 = sshll.u32 %s231_s10, 4  ;;  %p1338_p8 = pnand %p634_p6, %p276_p7  ;;  %s233_s3 = int_to_ptr.hbm [resolvable:$true] %s232_s3 }
  0x28   : > { %696 = dma.hbm_to_vmem [thread:$0]  (!%p1323_p5), %s233_s3, 512, %s235_s4, %s1332_s12, %s1186_s8, %s1187_s11, %s1188_s14  }
  0x29   : > { %s1629_s27 = scalar_select %p1338_p8, 1, 0 }
  0x2a   : > { %s41_s10 = sadd.s32 1, %s1176_s5  ;;  %p39_p9 = scmp.ge.s32.totalorder %s38_s9, 3 }
  0x2b   : > { %1630 = sst [smem:[#allocation25_spill]] %s1629_s27  ;;  %s45_s13 = sadd.s32 1, %s1180_s6 }
  0x2c   : > { %s54_s3 = sadd.s32 1, %s1156_s26  ;;  %p61_p10 = scmp.ne.s32.totalorder %s1156_s26, %s1152_s25 }
  0x2d   : > { %s1691_s9 = smov (%p39_p9, %s38_s9), 0  ;;  %s1693_s10 = smov (!%p39_p9, %s41_s10), %s1176_s5 }
  0x2e   : > { %1631 = sst [smem:[#allocation26_spill]] %s1691_s9  ;;  %s50_s4 = ssub.s32 %s1172_s30, %s1691_s9 }
  0x2f   : > { %p1359_p11 = por %p1608_p0, %p61_p10  ;;  %p43_p12 = scmp.ge.s32.totalorder %s1693_s10, 3 }
  0x30   : > { %p67_p13 = scmp.ne.s32.totalorder %s1152_s25, %s1148_s24  ;;  %p1607_p1 = scmp.eq.s32.totalorder %s1343_s28, 0 }
  0x31   : > { %s162_s11 = sadd.s32 1, %s1120_s17  ;;  %s1695_s10 = smov (%p43_p12, %s1693_s10), 0 }
  0x32   : > { %1633 = sst [smem:[#allocation27_spill]] %s1695_s10  ;;  %s1697_s13 = smov (!%p43_p12, %s45_s13), %s1180_s6 }
  0x33   : > { %p1372_p4 = por %p1607_p1, %p67_p13  ;;  %s1378_s29 = ssub.s32 %s1176_s5, %s1695_s10 }
  0x34   : > { %p47_p5 = scmp.ge.s32.totalorder %s1697_s13, 3  ;;  %s79_s24 = sor.u32 %s1378_s29, %s50_s4 }
  0x35   : > { %s1634_s14 = scalar_select %p1372_p4, 1, 0 }
  0x36   : > { %p80_p6 = scmp.eq.s32.totalorder %s79_s24, 0  ;;  %p1386_p7 = por %p95_p2, %p1607_p1 }
  0x37   : > { %1635 = sst [smem:[#allocation28_spill]] %s1634_s14  ;;  %s1699_s13 = smov (%p47_p5, %s1697_s13), 0 }
  0x38   : > { %s1636_s1 = scalar_select %p1386_p7, 1, 0 }
  0x39   : > { %1638 = sst [smem:[#allocation30_spill]] %s1699_s13  ;;  %s1639_s10 = sadd.s32 1, %s1144_s23 }
  0x3a   : > { %1637 = sst [smem:[#allocation29_spill]] %s1636_s1  ;;  %s49_s14 = ssub.s32 %s1180_s6, %s1699_s13 }
  0x3b   : > { %s1395_s9 = scalar_select %p80_p6, %s1144_s23, %s1639_s10  }
  0x3c   : > { %p106_p9 = scmp.eq.s32.totalorder %s1378_s29, 0  ;;  %s51_s25 = sor.u32 %s50_s4, %s49_s14 }
  0x3d   : > { %1640 = sst [smem:[#allocation31_spill]] %s1395_s9  ;;  %s159_s27 = sor.u32 %s1378_s29, %s49_s14 }
  0x3e   : > { %p52_p10 = scmp.eq.s32.totalorder %s51_s25, 0  ;;  %p160_p12 = scmp.eq.s32.totalorder %s159_s27, 0 }
  0x3f   : > { %p172_p2 = scmp.ne.s32.totalorder %s1120_s17, %s1116_s16  ;;  %p173_p13 = scmp.eq.s32.totalorder %s1343_s28, 26 }
  0x40   : > { %s1405_s21 = scalar_select %p52_p10, %s1156_s26, %s54_s3  }
  0x41   : > { %s1408_s24 = scalar_select %p160_p12, %s1120_s17, %s162_s11  }
  0x42   : > { %1641 = sst [smem:[#allocation32_spill]] %s1405_s21  ;;  %p1410_p5 = por %p173_p13, %p172_p2 }
  0x43   : > { %p178_p6 = scmp.ne.s32.totalorder %s1116_s16, %s1112_s15  ;;  %s1643_s10 = sadd.s32 4294967294, %s1184_s7  }
  0x44   : > { %p179_p1 = scmp.eq.s32.totalorder %s1643_s10, 26  ;;  %s199_s4 = sand.u32 1, %s1156_s26  }
  0x45   : > { %s628_s25 = sshll.u32 %s199_s4, 3  ;;  %s665_s3 = smul.u32 3, %s1180_s6 }
  0x46   : > { %p1419_p0 = por %p179_p1, %p178_p6  ;;  %s203_s11 = scalar_lea.vmem [#allocation3], %s628_s25 }
  0x47   : > { %s213_s14 = sshll.u32 %s203_s11, 4  ;;  %p691_p10 = pnand %p707_p3, %p1359_p11  ;;  %s214_s14 = int_to_ptr.vmem [resolvable:$true] %s213_s14 }
  0x48   : > { %s207_s10 = sadd.s32 %s1172_s30, %s665_s3  ;;  %s1645_s0 = sld [smem:[#allocation34_spill]] }
  0x49   : > { %s629_s13 = sshll.u32 %s207_s10, 3  ;;  %s200_s6 = scalar_lea.sflag [#allocation4], %s199_s4 }
  0x4a   : > { %s108_s25 = sadd.s32 1, %s1132_s20  ;;  %p115_p1 = scmp.ne.s32.totalorder %s1132_s20, %s1128_s19 }
  0x4b   : > { %s1438_s8 = scalar_select %p106_p9, %s1132_s20, %s108_s25  }
  0x4c   : > { %p1647_p12 = scmp.eq.s32.totalorder %s1184_s7, 0  ;;  %p121_p2 = scmp.ne.s32.totalorder %s1128_s19, %s1124_s18 }
  0x4d   : > { %1646 = sst [smem:[#allocation33_spill]] %s1438_s8  ;;  %s246_s3 = sand.u32 1, %s1132_s20  }
  0x4e   : > { %s209_s9 = scalar_lea.hbm %s1645_s0, %s629_s13  ;;  %p117_p11 = por %p115_p1, %p1647_p12 }
  0x4f   : > { %s211_s23 = sshll.u32 %s209_s9, 4  ;;  %s1648_s2 = sld [smem:[#allocation36_spill]]  ;;  %s212_s23 = int_to_ptr.hbm [resolvable:$true] %s211_s23 }
  0x50   : > { %693 = dma.hbm_to_vmem [thread:$0]  (!%p691_p10), %s212_s23, 128, %s214_s14, %s200_s6  }
  0x51   : > { %p1649_p13 = scmp.eq.s32.totalorder %s1343_s28, 0  ;;  %s247_s6 = scalar_lea.vmem [#allocation8], %s246_s3 }
  0x52   : > { %s254_s13 = sshll.u32 %s247_s6, 4  ;;  %p697_p9 = pnand %p707_p3, %p117_p11  ;;  %s255_s13 = int_to_ptr.vmem [resolvable:$true] %s254_s13 }
  0x53   : > { %p1451_p6 = por %p121_p2, %p1649_p13  ;;  %s1651_s18 = sld [smem:[#allocation37_spill]] }
  0x54   : > { %s264_s25 = scalar_lea.vmem [#allocation9], %s246_s3  ;;  %s262_s10 = scalar_lea.sflag [#allocation10], %s246_s3 }
  0x55   : > { %s250_s26 = scalar_lea.hbm %s1648_s2, %s1176_s5  ;;  %s271_s11 = sshll.u32 %s264_s25, 4  ;;  %s272_s11 = int_to_ptr.vmem [resolvable:$true] %s271_s11 }
  0x56   : > { %s252_s23 = sshll.u32 %s250_s26, 4  ;;  %s1653_s26 = sld [smem:[#allocation18_spill]] (!%p1338_p8)  ;;  %s253_s23 = int_to_ptr.hbm [resolvable:$true] %s252_s23 }
  0x57   : > { %699 = dma.hbm_to_vmem [thread:$0]  (!%p697_p9), %s253_s23, 16, %s255_s13, %s1332_s12  }
  0x58   : > { %280 = sbr.rel (%p1338_p8) target bundleno = 331 (0x14b), region = 36 }
  0x59   : > { %s267_s4 = scalar_lea.hbm %s1651_s18, %s1176_s5 }
  0x5a   : > { %s269_s14 = sshll.u32 %s267_s4, 4  ;;  %s270_s14 = int_to_ptr.hbm [resolvable:$true] %s269_s14 }
  0x5b   : > { %702 = dma.hbm_to_vmem [thread:$0]  (!%p697_p9), %s270_s14, 16, %s272_s11, %s262_s10  }
  0x5c   : > { %s282_s2 = sand.u32 (!%p1338_p8), 1, %s1653_s26  }
  0x5d   : > { %s1465_s30 = sshll.u32 %s282_s2, 3  ;;  %s283_s8 = scalar_lea.sflag [#allocation4], %s282_s2 }
  0x5e   : > { %s286_s29 = scalar_lea.vmem [#allocation3], %s1465_s30 }
  0x5f   : > { %1091 = dma.done.wait (%p1372_p4), %s283_s8, 128  }
  0x60   : > { %1093 = vsyncadd (%p1372_p4), %s283_s8, 4294967168  ;;  %s292_s3 = sand.u32 1, %s1343_s28   ;;  %s294_s23 = sand.u32 1, %s1140_s22  }
  0x61   : > { %s636_s0 = sshll.u32 %s294_s23, 5  ;;  %s293_s13 = scalar_lea.sflag [#allocation7], %s292_s3 }
  0x62   : > { %s296_s21 = scalar_lea.vmem [#allocation6], %s636_s0 }
  0x63   : > { %1095 = dma.done.wait (%p1386_p7), %s293_s13, 512  }
  0x64   : > { %1097 = vsyncadd (%p1386_p7), %s293_s13, 4294966784  ;;  %s1479_s2 = sand.u32 1, %s1128_s19  }
  0x65   : > { %s305_s30 = scalar_lea.vmem [#allocation8], %s1479_s2 }
  0x66   : > { %1099 = dma.done.wait (%p1451_p6), %s293_s13, 16  }
  0x67   : > { %1101 = vsyncadd (%p1451_p6), %s293_s13, 4294967280  ;;  %s312_s28 = scalar_lea.sflag [#allocation10], %s1479_s2  ;;  %s314_s8 = scalar_lea.vmem [#allocation9], %s1479_s2 }
  0x68   : > { %1103 = dma.done.wait (%p1451_p6), %s312_s28, 16  }
  0x69   : > { %1105 = vsyncadd (%p1451_p6), %s312_s28, 4294967280  ;;  %s350_s18 = sand.u32 1, %s1116_s16   ;;  %v358_v0 = vld [vmem:[%s296_s21 + $0x18] sm:$0xff]  ;;  %v357_v1 = vld [vmem:[%s296_s21 + $0x10] sm:$0xff]  ;;  %s1656_s14 = sld [smem:[#allocation20_spill]] }
  0x6a   : > { %s1495_s4 = sshll.u32 %s350_s18, 3  ;;  %359 = vmatpush.s8.msra.mxu0 %v358_v0  ;;  %v356_v2 = vld [vmem:[%s296_s21 + $0x8] sm:$0xff]  ;;  %v355_v3 = vld [vmem:[%s296_s21] sm:$0xff]  ;;  %v354_v4 = vld [vmem:[%s286_s29] sm:$0xff] }
  0x6b   : > { %s352_s9 = scalar_lea.vmem [#allocation11], %s1495_s4 }
  0x6e   : > { %360 = vmatpush.s8.msra.mxu0 %v357_v1 }
  0x6f   : > { %p638_p3 = scmp.ne.s32.totalorder %s1656_s14, 0 }
  0x72   : > { %361 = vmatpush.s8.msra.mxu0 %v356_v2 }
  0x76   : > { %362 = vmatpush.s8.msra.mxu0 %v355_v3 }
  0x79   : > { %363 = vmatmul.s8.vlgmr.msra.gmra.mxu0 %v354_v4 }
  0xec   : > { %v364_v5 = vpop.s32.mrf.mxu0 }
  0xf0   : > { %v366_v6 = vpop.s32.mrf.mxu0 }
  0xf4   : > { %v368_v7 = vpop.s32.mrf.mxu0  ;;  %376 = sbr.rel (%p638_p3) target bundleno = 253 (0xfd), region = 56 }
  0xf8   : > { %v370_v8 = vpop.s32.mrf.mxu0 }
  0xf9   : > { %377 = vst [vmem:[#allocation2 + $0x10] sm:$0xff] %v364_v5 }
  0xfa   : > { %378 = vst [vmem:[#allocation2] sm:$0xff] %v366_v6 }
  0xfb   : > { %379 = vst [vmem:[#allocation2 + $0x18] sm:$0xff] %v368_v7 }
  0xfc   : > { %380 = vst [vmem:[#allocation2 + $0x8] sm:$0xff] %v370_v8 }
  0xfd PF: > { %s1657_s25 = sld [smem:[#allocation20_spill]] }
 0x103   : > { %p639_p8 = scmp.le.s32.totalorder %s1657_s25, 0 }
 0x105   : > { %384 = sbr.rel (%p639_p8) target bundleno = 273 (0x111), region = 60 }
 0x10a   : > { %v385_v9 = vld [vmem:[#allocation2 + $0x10] sm:$0xff]  ;;  %v386_v10 = vld [vmem:[#allocation2] sm:$0xff]  ;;  %v387_v11 = vld [vmem:[#allocation2 + $0x18] sm:$0xff] }
 0x10b   : > { %v389_v12 = vadd.s32 %v385_v9, %v364_v5  ;;  %v390_v13 = vadd.s32 %v386_v10, %v366_v6  ;;  %v391_v14 = vadd.s32 %v387_v11, %v368_v7  ;;  %v388_v15 = vld [vmem:[#allocation2 + $0x8] sm:$0xff] }
 0x10c   : > { %v392_v16 = vadd.s32 %v388_v15, %v370_v8 }
 0x10d   : > { %393 = vst [vmem:[#allocation2 + $0x10] sm:$0xff] %v389_v12 }
 0x10e   : > { %394 = vst [vmem:[#allocation2] sm:$0xff] %v390_v13 }
 0x10f   : > { %395 = vst [vmem:[#allocation2 + $0x18] sm:$0xff] %v391_v14 }
 0x110   : > { %396 = vst [vmem:[#allocation2 + $0x8] sm:$0xff] %v392_v16 }
 0x111 PF: > { %s1658_s11 = sld [smem:[#allocation20_spill]] }
 0x117   : > { %p640_p4 = scmp.ne.s32.totalorder %s1658_s11, 2 }
 0x119   : > { %400 = sbr.rel (%p640_p4) target bundleno = 307 (0x133), region = 64 }
 0x11e   : > { %v401_v17 = vld [vmem:[#allocation2 + $0x10] sm:$0xff]  ;;  %v402_v18 = vld [vmem:[#allocation2] sm:$0xff]  ;;  %v403_v19 = vld [vmem:[#allocation2 + $0x18] sm:$0xff] }
 0x11f   : > { %v404_v20 = vld [vmem:[#allocation2 + $0x8] sm:$0xff]  ;;  %v864_v21 = vld [vmem:[%s305_s30] ss:$0 sm:$0xff] }
 0x120   : > { %v407_v22 = vadd.s32 %v864_v21, %v401_v17  ;;  %v408_v23 = vadd.s32 %v864_v21, %v402_v18  ;;  %v409_v24 = vadd.s32 %v864_v21, %v403_v19  ;;  %v410_v25 = vadd.s32 %v864_v21, %v404_v20  ;;  %v865_v26 = vld [vmem:[%s314_s8] ss:$0 sm:$0xff] }
 0x122   : > { %v411_v27 = vcvt.s32.f32 %v407_v22  ;;  %v412_v28 = vcvt.s32.f32 %v408_v23  ;;  %v413_v29 = vcvt.s32.f32 %v409_v24  ;;  %v414_v30 = vcvt.s32.f32 %v410_v25 }
 0x124   : > { %v419_v31 = vmul.f32 %v865_v26, %v411_v27  ;;  %v420_v32 = vmul.f32 %v865_v26, %v412_v28  ;;  %v421_v33 = vmul.f32 %v865_v26, %v413_v29  ;;  %v422_v34 = vmul.f32 %v865_v26, %v414_v30 }
 0x126   : > { %v423_v35 = vadd.f32 3.0, %v419_v31  ;;  %v424_v36 = vadd.f32 3.0, %v420_v32  ;;  %v425_v37 = vadd.f32 3.0, %v421_v33  ;;  %v426_v38 = vadd.f32 3.0, %v422_v34 }
 0x128   : > { %v649_v39 = vmax.f32 %v423_v35, -128.0  ;;  %v652_v40 = vmax.f32 %v424_v36, -128.0  ;;  %v655_v41 = vmax.f32 %v425_v37, -128.0  ;;  %v658_v42 = vmax.f32 %v426_v38, -128.0 }
 0x12a   : > { %v650_v43 = vmin.f32 %v649_v39, 127.0  ;;  %v653_v44 = vmin.f32 %v652_v40, 127.0  ;;  %v656_v45 = vmin.f32 %v655_v41, 127.0  ;;  %v659_v46 = vmin.f32 %v658_v42, 127.0 }
 0x12c   : > { %v669_v47 = vcvt.f32.s32 %v650_v43  ;;  %v672_v48 = vcvt.f32.s32 %v653_v44  ;;  %v675_v49 = vcvt.f32.s32 %v656_v45  ;;  %v678_v50 = vcvt.f32.s32 %v659_v46 }
 0x12e   : > { %v451_v51 = vpack.c.b16 %v672_v48, %v669_v47  ;;  %v452_v52 = vpack.c.b16 %v678_v50, %v675_v49 }
 0x130   : > { %v453_v53 = vpack.c.b8 %v452_v52, %v451_v51 }
 0x132   : > { %454 = vst [vmem:[%s352_s9] sm:$0xff] %v453_v53 }
 0x133 PF: > { %s1659_s10 = sld [smem:[#allocation22_spill]]  ;;  %s470_s29 = sshll.u32 %s352_s9, 4  ;;  %s471_s29 = int_to_ptr.vmem [resolvable:$true] %s470_s29 }
 0x134   : > { %s1660_s26 = sld [smem:[#allocation21_spill]]  ;;  %s456_s30 = scalar_lea.sflag [#allocation5], %s350_s18 }
 0x135   : > { %s1661_s13 = sld [smem:[#allocation38_spill]] }
 0x139   : > { %s679_s6 = smul.u32 3, %s1659_s10 }
 0x13b   : > { %s466_s12 = sadd.s32 %s1660_s26, %s679_s6  ;;  %s1006_s14 = scalar_lea.hbm %s1661_s13, 72 }
 0x13c   : > { %s662_s3 = sshll.u32 %s466_s12, 3 }
 0x13d   : > { %s468_s21 = scalar_lea.hbm %s1661_s13, %s662_s3 }
 0x13e   : > { %s472_s2 = sshll.u32 %s468_s21, 4  ;;  %s473_s2 = int_to_ptr.hbm [resolvable:$true] %s472_s2 }
 0x13f   : > { %s1000_s28 = sshra.s32 %s473_s2, 4  ;;  %s1001_s28 = int_to_ptr.hbm [resolvable:$true] %s1000_s28 }
 0x140   : > { %s1002_s8 = scalar_lea.hbm %s1001_s28, 8  ;;  %p1007_p12 = scmp.lt.s32.totalorder %s1001_s28, %s1661_s13 }
 0x141   : > { %p1003_p7 = scmp.ne.s32.totalorder %s1001_s28, %s1002_s8  ;;  %p1008_p11 = scmp.lt.s32.totalorder %s1006_s14, %s1002_s8 }
 0x143   : > { %p1004_p10 = pnand %p1003_p7, %p1410_p5  ;;  %p1009_p2 = por %p1008_p11, %p1007_p12 }
 0x145   : > { %p1005_p1 = pneg %p1004_p10 }
 0x147   : > { %p1010_p13 = pnand %p1009_p2, %p1005_p1 }
 0x149   : > { %1013 = shalt.err (!%p1010_p13)
}
 0x14a   : > { %688 = dma.vmem_to_hbm [thread:$0]  (%p1410_p5), %s471_s29, 128, %s473_s2, %s456_s30  }
 0x14b PF: > { %p708_p6 = scmp.ge.s32.totalorder %s1184_s7, 2  ;;  %s484_s18 = sand.u32 1, %s1112_s15  }
 0x14c   : > { %s485_s10 = scalar_lea.sflag [#allocation5], %s484_s18 }
 0x14d   : > { %p704_p9 = pnand %p708_p6, %p1419_p0 }
 0x14f   : > { %p705_p3 = pneg %p704_p9 }
 0x151   : > { %1107 = dma.done.wait (%p705_p3), %s485_s10, 128  }
 0x152   : > { %1109 = vsyncadd (%p705_p3), %s485_s10, 4294967168  ;;  %s26_s7 = sadd.s32 1, %s1184_s7   ;;  %s1663_s1 = sld [smem:[#allocation33_spill]] }
 0x153   : > { %p1531_p8 = scmp.ge.s32.totalorder %s26_s7, 29   ;;  %s1664_s6 = sld [smem:[#allocation17_spill]] }
 0x154   : > { %s1665_s23 = sld [smem:[#allocation31_spill]]  ;;  %s1672_s15 = smov %s1116_s16 }
 0x155   : > { %s1666_s27 = sld [smem:[#allocation18_spill]]  ;;  %s1674_s16 = smov %s1120_s17 }
 0x156   : > { %s1667_s25 = sld [smem:[#allocation19_spill]]  ;;  %s1676_s17 = smov %s1408_s24 }
 0x157   : > { %s1668_s29 = sld [smem:[#allocation32_spill]]  ;;  %s1677_s18 = smov %s1128_s19 }
 0x158   : > { %s1669_s12 = sld [smem:[#allocation23_spill]]  ;;  %s1679_s19 = smov %s1132_s20 }
 0x159   : > { %s1670_s3 = sld [smem:[#allocation24_spill]]  ;;  %s1680_s20 = smov %s1663_s1 }
 0x15a   : > { %s1671_s30 = sld [smem:[#allocation26_spill]]  ;;  %s1681_s21 = smov %s1140_s22 }
 0x15b   : > { %s1673_s0 = sld [smem:[#allocation27_spill]]  ;;  %s1682_s22 = smov %s1664_s6 }
 0x15c   : > { %s1675_s2 = sld [smem:[#allocation30_spill]]  ;;  %s1683_s24 = smov %s1666_s27 }
 0x15d   : > { %s1684_s26 = smov %s1668_s29  ;;  %s1686_s28 = smov %s1176_s5 }
 0x15e   : > { %s1685_s27 = smov %s1669_s12  ;;  %25 = sbr.rel (!%p1531_p8) target bundleno = 23 (0x17), region = 130 }
 0x15f   : > { %s1687_s29 = smov %s1670_s3 }
 0x161   : > { %s1688_s5 = smov %s1673_s0 }
 0x162   : > { %s1689_s6 = smov %s1675_s2 }
 0x163   :  { %491 = vsyncpa [#allocation4], 1 }
 0x164   :  { %493 = vsyncpa [#allocation4 + $0x1], 1 }
 0x165   :  { %494 = vsyncpa [#allocation7], 1 }
 0x166   :  { %496 = vsyncpa [#allocation7 + $0x1], 1 }
 0x167   :  { %497 = vsyncpa [#allocation10], 1 }
 0x168   :  { %499 = vsyncpa [#allocation10 + $0x1], 1 }
 0x169   :  { %500 = vsyncpa [#allocation5], 1 }
 0x16a   :  { %502 = vsyncpa [#allocation5 + $0x1], 1 }

</bundles_post_ra>
